<compile_context>
chip_gen: v7x
topology: tpu7x:2x2x1
jax: 0.10.0
libtpu: 0.0.40
codegen_flags: <defaults>
</compile_context>

<pallas_src>
import functools

import jax
import jax.numpy as jnp
from jax.experimental import pallas as pl
from jax.experimental.pallas import tpu as pltpu


def _round_up(x, m):
    return (x + m - 1) // m * m


def _vmem_capacity_bytes():
    try:
        return int(pltpu.get_tpu_info().vmem_capacity_bytes)
    except Exception:
        return 64 * 1024 * 1024  # conservative fallback (v7x per-core physical VMEM)


def _pick_block_batch(B, N, H, K, N_out, h_bytes, cmp_bytes, out_bytes, attn_bytes,
                      vmem_limit):
    """Largest batch block fitting the requested VMEM limit, with >= 2 grid steps."""
    # Resident (constant-index-map) operands: packed weights + bias.
    resident = H * K * H * cmp_bytes + K * H * 4
    # Per-batch-row working set.
    per_b = (2 * N * H * h_bytes                                        # double-buffered h block
             + (N * H * cmp_bytes if cmp_bytes != h_bytes else 0)       # in-kernel MXU-dtype copy
             + 4 * K * N_out * 4                                        # scores / exp / attn f32 temps
             + 2 * (K * H * out_bytes + K * N_out * attn_bytes)         # double-buffered outputs
             + 3 * K * H * 4 + H * 4)                                   # z / new_h / mean temps
    slack = 4 * 1024 * 1024
    budget = max(vmem_limit - resident - slack, per_b)
    bb_vmem = max(1, budget // max(per_b, 1))

    # >= 2 grid steps (more for larger B): lets v7x split the parallel batch axis over its two
    # TensorCores and gives the BlockSpec pipeline something to prefetch.
    if B >= 64:
        min_steps = 8
    elif B >= 16:
        min_steps = 4
    elif B >= 2:
        min_steps = 2
    else:
        min_steps = 1
    bb_steps = pl.cdiv(B, min_steps)
    return int(max(1, min(bb_vmem, bb_steps, B)))


def _attention_pooling_kernel(h_ref, w_ref, b_ref, out_ref, attn_ref, *,
                              n_nodes, compute_dtype):
    """One batch block per grid step.

    h_ref   : (Bb, N, H)      node hidden states, HBM dtype (no wrapper-side cast)
    w_ref   : (H, K*H)        packed readout weights (x @ W), compute_dtype (resident)
    b_ref   : (1, K*H)        packed readout biases, f32 (resident)
    out_ref : (Bb, K, H)      pooled hidden states
    attn_ref: (Bb, K, N_out)  attention weights (N_out == N, or 128-padded for large N)
    """
    Bb, N, H = h_ref.shape
    KH = w_ref.shape[1]
    K = KH // H
    N_out = attn_ref.shape[2]

    h_raw = h_ref[...]                                                  # (Bb, N, H)

    # Node mean with f32 accumulation; no materialized f32 copy of the tile.
    h_mean = jnp.sum(h_raw, axis=1, dtype=jnp.float32) * jnp.float32(1.0 / n_nodes)  # (Bb, H)

    # Operands fed to the MXU (no-op on the pure f32 path).
    h_mm = h_raw.astype(compute_dtype)

    # Fused K-head 'mult' readout: a single (Bb,H)@(H,K*H) matmul.
    z = jnp.dot(h_mean.astype(compute_dtype), w_ref[...],
                preferred_element_type=jnp.float32) + b_ref[...]        # (Bb, K*H) f32
    z3 = z.reshape(Bb, K, H)                                            # (Bb, K, H)

    # Dot-product attention scores: contract on H directly (no explicit h.T).
    scores = jnp.einsum("bkh,bnh->bkn", z3.astype(compute_dtype), h_mm,
                        preferred_element_type=jnp.float32)             # (Bb, K, N)

    if N_out > N:  # static: lane-dense attn writeback for large N -> append masked key columns
        pad = jnp.full((Bb, K, N_out - N), jnp.float32(-1e30), jnp.float32)
        scores = jnp.concatenate([scores, pad], axis=-1)                # (Bb, K, N_out)

    # Numerically-stable softmax in f32.
    m = jnp.max(scores, axis=-1, keepdims=True)
    e = jnp.exp(scores - m)
    s = jnp.sum(e, axis=-1, keepdims=True)                              # >= 1 (max-subtracted)
    inv = pl.reciprocal(s, approx=True)         # EUP slot instead of a VPU divide
    inv = inv * (2.0 - s * inv)                 # one Newton step on (Bb,K,1): keeps f32 accuracy
    attn = e * inv                              # (Bb, K, N_out); padded columns exactly 0

    attn_real = attn[:, :, :N] if N_out > N else attn
    new_h = jnp.einsum("bkn,bnh->bkh", attn_real.astype(compute_dtype), h_mm,
                       preferred_element_type=jnp.float32)              # (Bb, K, H)

    out_ref[...] = new_h.astype(out_ref.dtype)
    attn_ref[...] = attn.astype(attn_ref.dtype)


def attention_pooling(h, w_torch, b, *, compute_dtype=None, attn_dtype=None,
                      block_batch=None):
    """h: (B, N, H); w_torch: (K, H_out, H_in) PyTorch-Linear layout; b: (K, H).

    compute_dtype: dtype fed to the MXU (cast in VMEM inside the kernel; pass h already in bf16
    from the producer if you want the full HBM-stream halving). attn_dtype: dtype of the returned
    attention weights (bf16 halves the attn writeback for large N).
    """
    B, N, H = h.shape
    K = b.shape[0]
    out_dtype = h.dtype
    compute_dtype = jnp.dtype(compute_dtype) if compute_dtype is not None else jnp.dtype(h.dtype)
    attn_dtype = jnp.dtype(attn_dtype) if attn_dtype is not None else jnp.dtype(out_dtype)
    h_bytes = jnp.dtype(h.dtype).itemsize
    cmp_bytes = compute_dtype.itemsize
    out_bytes = jnp.dtype(out_dtype).itemsize
    attn_bytes = attn_dtype.itemsize

    # Adaptive attn-output width: full N for small graphs (masked partial stores beat a 16x-wider
    # store stream); lane-dense 128-multiple only when the relative padding is small.
    if N % 128 == 0 or N < 512:
        N_out = N
    else:
        N_out = _round_up(N, 128)

    vmem_cap = _vmem_capacity_bytes()
    vmem_limit = int(vmem_cap * 3 // 4)
    if block_batch is None:
        Bb = _pick_block_batch(B, N, H, K, N_out, h_bytes, cmp_bytes,
                               out_bytes, attn_bytes, vmem_limit)
    else:
        Bb = max(1, min(int(block_batch), B))
    B_pad = _round_up(B, Bb)

    # Pack the K PyTorch-Linear weights (K, H_out, H_in) into one (H_in, K*H_out) matrix so the
    # readout is a single matmul (PyTorch computes x @ W^T + b); bias -> (1, K*H).
    w_all = jnp.transpose(w_torch, (2, 0, 1)).reshape(H, K * H).astype(compute_dtype)
    b_all = b.reshape(1, K * H).astype(jnp.float32)

    # No node-axis padding and no dtype cast of h here: only a (cheap, often skipped) batch pad.
    h_pad = h if B_pad == B else jnp.pad(h, ((0, B_pad - B), (0, 0), (0, 0)))

    kernel = functools.partial(_attention_pooling_kernel,
                               n_nodes=N, compute_dtype=compute_dtype)

    flops = 2 * B_pad * K * H * (H + 2 * N)
    transcendentals = B_pad * K * N_out
    bytes_accessed = (B_pad * N * H * h_bytes
                      + H * K * H * cmp_bytes + K * H * 4
                      + B_pad * K * H * out_bytes
                      + B_pad * K * N_out * attn_bytes)

    grid_spec = pltpu.PrefetchScalarGridSpec(
        num_scalar_prefetch=0,
        grid=(B_pad // Bb,),
        in_specs=[
            pl.BlockSpec((Bb, N, H), lambda i: (i, 0, 0)),       # h, streamed batch blocks
            pl.BlockSpec((H, K * H), lambda i: (0, 0)),          # packed weights (resident)
            pl.BlockSpec((1, K * H), lambda i: (0, 0)),          # packed biases  (resident)
        ],
        out_specs=(
            pl.BlockSpec((Bb, K, H), lambda i: (i, 0, 0)),
            pl.BlockSpec((Bb, K, N_out), lambda i: (i, 0, 0)),
        ),
    )

    new_h, attn = pl.pallas_call(
        kernel,
        out_shape=(
            jax.ShapeDtypeStruct((B_pad, K, H), out_dtype),       # new_hiddens
            jax.ShapeDtypeStruct((B_pad, K, N_out), attn_dtype),  # attns
        ),
        grid_spec=grid_spec,
        compiler_params=pltpu.CompilerParams(
            dimension_semantics=("parallel",),                    # v7x: shard batch over 2 TCs
            vmem_limit_bytes=vmem_limit,
        ),
        cost_estimate=pl.CostEstimate(flops=flops,
                                      transcendentals=transcendentals,
                                      bytes_accessed=bytes_accessed),
    )(h_pad, w_all, b_all)

    if B_pad != B:
        new_h = new_h[:B]
    if B_pad != B or N_out != N:
        attn = attn[:B, :, :N]
    return new_h, attn


def attention_pooling_reference(h, w_torch, b):
    """Pure-JAX reference of the PyTorch forward."""
    hm = jnp.mean(h, axis=1)                                       # (B, H)
    z = jnp.einsum("bi,koi->bko", hm, w_torch) + b[None]           # (B, K, H)
    scores = jnp.einsum("bkh,bnh->bkn", z, h)                      # (B, K, N)
    attn = jax.nn.softmax(scores, axis=-1)
    new_h = jnp.einsum("bkn,bnh->bkh", attn, h)                    # (B, K, H)
    return new_h, attn


if __name__ == "__main__":
    B, N, H, K = 2, 8, 32, 4          # batch, n_nodes, hidden, nodes_out

    key = jax.random.PRNGKey(0)
    k_h, k_w, k_b = jax.random.split(key, 3)
    h = jax.random.normal(k_h, (B, N, H), dtype=jnp.float32)
    # Deterministic PyTorch-Linear-style init: U(-1/sqrt(H), 1/sqrt(H)).
    bound = 1.0 / (H ** 0.5)
    w_torch = jax.random.uniform(k_w, (K, H, H), jnp.float32, -bound, bound)
    b = jax.random.uniform(k_b, (K, H), jnp.float32, -bound, bound)

    ref_h, ref_attn = attention_pooling_reference(h, w_torch, b)

    # f32 path: matches the reference to tight tolerance.
    new_h, attn = attention_pooling(h, w_torch, b)
    jax.block_until_ready((new_h, attn))
    assert new_h.shape == (B, K, H) and attn.shape == (B, K, N)
    assert jnp.allclose(new_h, ref_h, atol=1e-5, rtol=1e-5)
    assert jnp.allclose(attn, ref_attn, atol=1e-5, rtol=1e-5)
    assert jnp.allclose(jnp.sum(attn, axis=-1), 1.0, atol=1e-5)

    # bf16 MXU-operand path (h stays f32 in HBM; cast happens in VMEM inside the kernel).
    new_h16, attn16 = attention_pooling(h, w_torch, b, compute_dtype=jnp.bfloat16)
    jax.block_until_ready((new_h16, attn16))
    assert jnp.allclose(new_h16, ref_h, atol=5e-2, rtol=5e-2)
    assert jnp.allclose(attn16, ref_attn, atol=5e-2, rtol=5e-2)

    print("KERNEL_OK")
</pallas_src>

<mosaic_0001>
module attributes {stable_mosaic.version = 11 : i64} {
  func.func @_attention_pooling_kernel(%arg0: i32, %arg1: memref<1x8x32xf32, #tpu.memory_space<vmem>>, %arg2: memref<32x128xf32, #tpu.memory_space<vmem>>, %arg3: memref<1x128xf32, #tpu.memory_space<vmem>>, %arg4: memref<1x4x32xf32, #tpu.memory_space<vmem>>, %arg5: memref<1x4x8xf32, #tpu.memory_space<vmem>>) attributes {dimension_semantics = [#tpu.dimension_semantics<parallel>], iteration_bounds = array<i64: 2>, scalar_prefetch = 0 : i64, scratch_operands = 0 : i64, tpu.core_type = #tpu.core_type<tc>, window_params = [{transform_indices = @transform_0, window_bounds = array<i64: 1, 8, 32>}, {pipeline_mode = #tpu.pipeline_mode<synchronous>, transform_indices = @transform_1, window_bounds = array<i64: 32, 128>}, {pipeline_mode = #tpu.pipeline_mode<synchronous>, transform_indices = @transform_2, window_bounds = array<i64: 1, 128>}, {transform_indices = @transform_3, window_bounds = array<i64: 1, 4, 32>}, {transform_indices = @transform_4, window_bounds = array<i64: 1, 4, 8>}]} {
    %c0 = arith.constant 0 : index
    %c0_0 = arith.constant 0 : index
    %c0_1 = arith.constant 0 : index
    %0 = vector.load %arg1[%c0, %c0_0, %c0_1] : memref<1x8x32xf32, #tpu.memory_space<vmem>>, vector<1x8x32xf32>
    %cst = arith.constant dense<0.000000e+00> : vector<1x32xf32>
    %1 = vector.multi_reduction <add>, %0, %cst [1] : vector<1x8x32xf32> to vector<1x32xf32>
    %cst_2 = arith.constant 1.250000e-01 : f32
    %2 = vector.broadcast %cst_2 : f32 to vector<1x32xf32>
    %3 = arith.mulf %1, %2 : vector<1x32xf32>
    %c0_3 = arith.constant 0 : index
    %c0_4 = arith.constant 0 : index
    %4 = vector.load %arg2[%c0_3, %c0_4] : memref<32x128xf32, #tpu.memory_space<vmem>>, vector<32x128xf32>
    %cst_5 = arith.constant dense<0.000000e+00> : vector<1x128xf32>
    %5 = tpu.matmul %3, %4, %cst_5 {dimension_numbers = #tpu.dot_dimension_numbers<[1], [0], [0], [1], [0, 0, 1, 1], [], []>} : vector<1x32xf32>, vector<32x128xf32>, vector<1x128xf32> -> vector<1x128xf32>
    %c0_6 = arith.constant 0 : index
    %c0_7 = arith.constant 0 : index
    %6 = vector.load %arg3[%c0_6, %c0_7] : memref<1x128xf32, #tpu.memory_space<vmem>>, vector<1x128xf32>
    %7 = arith.addf %5, %6 : vector<1x128xf32>
    %8 = vector.shape_cast %7 : vector<1x128xf32> to vector<1x4x32xf32>
    "tpu.trace_start"() <{level = 10 : i32, message = "bkh,bnh->bkn"}> : () -> ()
    %cst_8 = arith.constant dense<0.000000e+00> : vector<1x4x8xf32>
    %9 = tpu.matmul %8, %0, %cst_8 {dimension_numbers = #tpu.dot_dimension_numbers<[2], [2], [1], [1], [0, 0, 0, 1, 1, 1], [0], [0]>} : vector<1x4x32xf32>, vector<1x8x32xf32>, vector<1x4x8xf32> -> vector<1x4x8xf32>
    "tpu.trace_stop"() : () -> ()
    %cst_9 = arith.constant dense<0xFF800000> : vector<1x4xf32>
    %10 = vector.multi_reduction <maximumf>, %9, %cst_9 [2] : vector<1x4x8xf32> to vector<1x4xf32>
    %11 = vector.shape_cast %10 : vector<1x4xf32> to vector<1x4x1xf32>
    %12 = vector.broadcast %11 : vector<1x4x1xf32> to vector<1x4x8xf32>
    %13 = arith.subf %9, %12 : vector<1x4x8xf32>
    %14 = math.exp %13 : vector<1x4x8xf32>
    %cst_10 = arith.constant dense<0.000000e+00> : vector<1x4xf32>
    %15 = vector.multi_reduction <add>, %14, %cst_10 [2] : vector<1x4x8xf32> to vector<1x4xf32>
    %16 = vector.shape_cast %15 : vector<1x4xf32> to vector<1x4x1xf32>
    %17 = tpu.reciprocal %16 {approx = true} : vector<1x4x1xf32> -> vector<1x4x1xf32>
    %18 = arith.mulf %16, %17 : vector<1x4x1xf32>
    %cst_11 = arith.constant 2.000000e+00 : f32
    %19 = vector.broadcast %cst_11 : f32 to vector<1x4x1xf32>
    %20 = arith.subf %19, %18 : vector<1x4x1xf32>
    %21 = arith.mulf %17, %20 : vector<1x4x1xf32>
    %22 = vector.broadcast %21 : vector<1x4x1xf32> to vector<1x4x8xf32>
    %23 = arith.mulf %14, %22 : vector<1x4x8xf32>
    "tpu.trace_start"() <{level = 10 : i32, message = "bkn,bnh->bkh"}> : () -> ()
    %cst_12 = arith.constant dense<0.000000e+00> : vector<1x4x32xf32>
    %24 = tpu.matmul %23, %0, %cst_12 {dimension_numbers = #tpu.dot_dimension_numbers<[2], [1], [1], [2], [0, 0, 0, 1, 1, 2], [0], [0]>} : vector<1x4x8xf32>, vector<1x8x32xf32>, vector<1x4x32xf32> -> vector<1x4x32xf32>
    "tpu.trace_stop"() : () -> ()
    %c0_13 = arith.constant 0 : index
    %c0_14 = arith.constant 0 : index
    %c0_15 = arith.constant 0 : index
    %25 = vector.load %arg4[%c0_13, %c0_14, %c0_15] : memref<1x4x32xf32, #tpu.memory_space<vmem>>, vector<1x4x32xf32>
    tpu.vector_store %arg4[%c0_13, %c0_14, %c0_15], %24 {strides = array<i32>} : memref<1x4x32xf32, #tpu.memory_space<vmem>>, vector<1x4x32xf32>,
    %c0_16 = arith.constant 0 : index
    %c0_17 = arith.constant 0 : index
    %c0_18 = arith.constant 0 : index
    %26 = vector.load %arg5[%c0_16, %c0_17, %c0_18] : memref<1x4x8xf32, #tpu.memory_space<vmem>>, vector<1x4x8xf32>
    tpu.vector_store %arg5[%c0_16, %c0_17, %c0_18], %23 {strides = array<i32>} : memref<1x4x8xf32, #tpu.memory_space<vmem>>, vector<1x4x8xf32>,
    return
  }
  func.func @transform_0(%arg0: i32) -> (i32, i32, i32) {
    %c0_i32 = arith.constant 0 : i32
    %c0_i32_0 = arith.constant 0 : i32
    %c0_i32_1 = arith.constant 0 : i32
    return %arg0, %c0_i32, %c0_i32_0 : i32, i32, i32
  }
  func.func @transform_1(%arg0: i32) -> (i32, i32) {
    %c0_i32 = arith.constant 0 : i32
    %c0_i32_0 = arith.constant 0 : i32
    %c0_i32_1 = arith.constant 0 : i32
    return %c0_i32, %c0_i32_0 : i32, i32
  }
  func.func @transform_2(%arg0: i32) -> (i32, i32) {
    %c0_i32 = arith.constant 0 : i32
    %c0_i32_0 = arith.constant 0 : i32
    %c0_i32_1 = arith.constant 0 : i32
    return %c0_i32, %c0_i32_0 : i32, i32
  }
  func.func @transform_3(%arg0: i32) -> (i32, i32, i32) {
    %c0_i32 = arith.constant 0 : i32
    %c0_i32_0 = arith.constant 0 : i32
    %c0_i32_1 = arith.constant 0 : i32
    return %arg0, %c0_i32, %c0_i32_0 : i32, i32, i32
  }
  func.func @transform_4(%arg0: i32) -> (i32, i32, i32) {
    %c0_i32 = arith.constant 0 : i32
    %c0_i32_0 = arith.constant 0 : i32
    %c0_i32_1 = arith.constant 0 : i32
    return %arg0, %c0_i32, %c0_i32_0 : i32, i32, i32
  }
}

</mosaic_0001>

<bundles_post_ra>
// kernel: tpu_custom_call.1
= control target key start
LH: loop header
LB: loop body
LE: loop exit
PB: predicated region body
PF: predicated region fallthrough
CT: control target
= control target key end

     0   :  { %10 = vsyncpa [#allocation3], 0  ;;  %s1248_s0 = inlined_call_operand.hbm [shape: f32[2,8,32], index: 0, kind: input, shape index: {}]   ;;  %s1249_s1 = inlined_call_operand.hbm [shape: f32[32,128], index: 1, kind: input, shape index: {}]   ;;  %s1250_s2 = inlined_call_operand.vmem [shape: f32[1,128], index: 2, kind: input, shape index: {}]   ;;  %s1251_s3 = inlined_call_operand.hbm [shape: f32[2,4,32], index: 3, kind: output, shape index: {0}]   ;;  %s1252_s4 = inlined_call_operand.hbm [shape: f32[2,4,8], index: 4, kind: output, shape index: {1}]  }
   0x1   :  { %12 = vsyncpa [#allocation3 + $0x1], 0 }
   0x2   :  { %13 = vsyncpa [#allocation6], 0 }
   0x3   :  { %14 = vsyncpa [#allocation4], 0 }
   0x4   :  { %16 = vsyncpa [#allocation4 + $0x1], 0 }
   0x5   :  { %17 = vsyncpa [#allocation9], 0 }
   0x6   :  { %19 = vsyncpa [#allocation9 + $0x1], 0  ;;  %s1007_s15 = smov 0   ;;  %s1009_s16 = smov 0  }
   0x7   :  { %s1011_s17 = smov 0   ;;  %s1013_s18 = smov 0  }
   0x8 LB: > { %s1028_s19 = sadd.s32 4294967295, %s966_s18   ;;  %s673_s20 = sadd.s32 4294967294, %s966_s18   ;;  %s966_s18 = sphi %s1013_s18, %s1272_s18   ;;  %s962_s17 = sphi %s1011_s17, %s1271_s17   ;;  %s958_s16 = sphi %s1009_s16, %s1270_s16   ;;  %s954_s15 = sphi %s1007_s15, %s1269_s15  }
   0x9   : > { %p45_p0 = scmp.ne.s32.totalorder %s958_s16, %s954_s15  ;;  %p1253_p1 = scmp.eq.s32.totalorder %s1028_s19, 0 }
   0xa   : > { %p117_p3 = scmp.eq.s32.totalorder %s673_s20, 1  ;;  %p674_p5 = scmp.ge.s32.totalorder %s966_s18, 1 }
   0xb   : > { %p1037_p4 = por %p1253_p1, %p45_p0  ;;  %p150_p7 = scmp.lt.s32.totalorder %s966_s18, 3 }
   0xc   : > { %p1042_p6 = por %p117_p3, %p45_p0  ;;  %s968_s24 = smov [#allocation5]  }
   0xd   : > { %s1256_s21 = scalar_select %p1037_p4, 1, 0 }
   0xe   : > { %s1257_s22 = scalar_select %p1042_p6, 1, 0 }
   0xf   : > { %p1047_p8 = pnand %p674_p5, %p150_p7  ;;  %s162_s25 = sshll.u32 %s968_s24, 4  ;;  %s1051_s25 = int_to_ptr.vmem [resolvable:$true] %s162_s25 }
  0x10   : > { %s1063_s27 = sadd.s32 1, %s966_s18   ;;  %s32_s28 = sadd.s32 1, %s962_s17 }
  0x11   : > { %s1258_s23 = scalar_select %p1047_p8, 1, 0 }
  0x12   : > { %p740_p9 = pneg %p1047_p8  ;;  %s29_s29 = ssub.s32 %s966_s18, %s1063_s27 }
  0x13   : > { %s806_s6 = scalar_lea.hbm %s1249_s1, 512 }
  0x14   : > { %p1058_p11 = pnand %p740_p9, %p1253_p1  ;;  %p807_p12 = scmp.ne.s32.totalorder %s1249_s1, %s806_s6 }
  0x15   : > { %p813_p5 = scmp.lt.u32.totalorder %s806_s6, %s1249_s1 }
  0x16   : > { %p808_p13 = pneg %p1058_p11 }
  0x18   : > { %p809_p0 = pnand %p808_p13, %p807_p12 }
  0x1a   : > { %p810_p3 = pneg %p809_p0 }
  0x1c   : > { %p815_p7 = pnand %p813_p5, %p810_p3 }
  0x1e   : > { %818 = shalt.err (!%p815_p7)
}
  0x1f   : > { %s819_s11 = scalar_lea.vmem %s1051_s25, 512  ;;  %p827_p2 = scmp.lt.s32.totalorder %s1051_s25, %s1051_s25 }
  0x20   : > { %p820_p9 = scmp.ne.s32.totalorder %s1051_s25, %s819_s11  ;;  %p828_p6 = scmp.lt.s32.totalorder %s819_s11, %s819_s11 }
  0x22   : > { %p822_p10 = pnand %p820_p9, %p808_p13  ;;  %p829_p4 = por %p828_p6, %p827_p2 }
  0x24   : > { %p823_p1 = pneg %p822_p10 }
  0x26   : > { %p830_p8 = pnand %p829_p4, %p823_p1 }
  0x28   : > { %833 = shalt.err (!%p830_p8)
}
  0x29   : > { %s969_s12 = smov 128   ;;  %s970_s13 = smov 8  }
  0x2a   : > { %743 = dma.hbm_to_vmem [thread:$0]  (!%p1058_p11), %s1249_s1, 512, %s1051_s25, [#allocation6], %s969_s12, %s969_s12, %s970_s13  }
  0x2b   : > { %p30_p2 = scmp.eq.s32.totalorder %s29_s29, 0  ;;  %p39_p1 = scmp.ne.s32.totalorder %s962_s17, %s958_s16 }
  0x2c   : > { %p40_p4 = scmp.eq.s32.totalorder %s966_s18, 0  ;;  %p756_p6 = scmp.lt.s32.totalorder %s966_s18, 2 }
  0x2d   : > { %s1094_s24 = scalar_select %p30_p2, %s962_s17, %s32_s28  }
  0x2e   : > { %p41_p8 = por %p40_p4, %p39_p1  ;;  %p1260_p10 = scmp.eq.s32.totalorder %s1028_s19, 1 }
  0x2f   : > { %s179_s5 = sand.u32 1, %s962_s17   ;;  %s678_s6 = sshll.u32 %s966_s18, 7 }
  0x30   : > { %p1098_p12 = por %p1260_p10, %p39_p1  ;;  %s677_s7 = sshll.u32 %s179_s5, 3 }
  0x31   : > { %s1107_s9 = scalar_lea.hbm %s1248_s0, %s678_s6  ;;  %s183_s25 = scalar_lea.vmem [#allocation2], %s677_s7 }
  0x32   : > { %s190_s28 = sshll.u32 %s183_s25, 4  ;;  %p1109_p11 = pnand %p756_p6, %p41_p8  ;;  %s1113_s28 = int_to_ptr.vmem [resolvable:$true] %s190_s28 }
  0x33   : > { %s180_s10 = scalar_lea.sflag [#allocation3], %s179_s5  ;;  %s834_s11 = scalar_lea.hbm %s1107_s9, 128 }
  0x34   : > { %p835_p13 = scmp.ne.s32.totalorder %s1107_s9, %s834_s11  ;;  %p836_p0 = pneg %p1109_p11 }
  0x35   : > { %s839_s14 = scalar_lea.hbm %s1248_s0, 256  ;;  %p840_p7 = scmp.lt.u32.totalorder %s1107_s9, %s1248_s0 }
  0x36   : > { %p837_p3 = pnand %p836_p0, %p835_p13  ;;  %p841_p9 = scmp.lt.u32.totalorder %s839_s14, %s834_s11 }
  0x37   : > { %p843_p1 = scmp.lt.u32.totalorder %s834_s11, %s1107_s9 }
  0x38   : > { %p838_p5 = pneg %p837_p3  ;;  %p842_p2 = por %p841_p9, %p840_p7 }
  0x3a   : > { %p844_p4 = por %p843_p1, %p842_p2 }
  0x3c   : > { %p845_p6 = pnand %p844_p4, %p838_p5 }
  0x3e   : > { %848 = shalt.err (!%p845_p6)
}
  0x3f   : > { %s849_s5 = scalar_lea.vmem %s1113_s28, 128  ;;  %s971_s7 = smov [#allocation2]  }
  0x40   : > { %p850_p8 = scmp.ne.s32.totalorder %s1113_s28, %s849_s5  ;;  %s854_s26 = sshll.u32 %s971_s7, 4  ;;  %s855_s26 = int_to_ptr.vmem [resolvable:$false] %s854_s26 }
  0x41   : > { %s856_s8 = scalar_lea.vmem %s855_s26, 256  ;;  %p857_p3 = scmp.lt.s32.totalorder %s1113_s28, %s855_s26 }
  0x42   : > { %p852_p10 = pnand %p850_p8, %p836_p0  ;;  %p858_p7 = scmp.lt.s32.totalorder %s856_s8, %s849_s5 }
  0x44   : > { %p853_p13 = pneg %p852_p10  ;;  %p859_p9 = por %p858_p7, %p857_p3 }
  0x46   : > { %p860_p2 = pnand %p859_p9, %p853_p13 }
  0x48   : > { %863 = shalt.err (!%p860_p2)
}
  0x49   : > { %747 = dma.hbm_to_vmem [thread:$0]  (!%p1109_p11), %s1107_s9, 128, %s1113_s28, %s180_s10  }
  0x4a   : > { %p1263_p5 = scmp.ne.s32.totalorder %s1258_s23, 0 }
  0x4b   : > { %s1143_s25 = sand.u32 (!%p1263_p5), 1, %s958_s16   ;;  %p1264_p0 = scmp.ne.s32.totalorder (!%p1263_p5), %s1256_s21, 0 }
  0x4c   : > { %199 = sbr.rel (%p1263_p5) target bundleno = 1204 (0x4b4), region = 32  ;;  %s680_s11 = sshll.u32 (!%p1263_p5), %s1143_s25, 3 }
  0x4d   : > { %s202_s12 = scalar_lea.sflag (!%p1263_p5), [#allocation3], %s1143_s25  ;;  %s205_s13 = scalar_lea.vmem (!%p1263_p5), [#allocation2], %s680_s11 }
  0x53   : > { %937 = dma.done.wait (%p1264_p0), %s202_s12, 128  }
  0x54   : > { %939 = vsyncadd (%p1264_p0), %s202_s12, 4294967168  ;;  %p1265_p1 = scmp.eq.s32.totalorder %s1028_s19, 0 }
  0x56   : > { %941 = dma.done.wait (%p1265_p1), [#allocation6], 512   ;;  %p1266_p11 = pmov %p1265_p1 }
  0x57   : > { %v972_v0 = vmov 0.0|0.0   ;;  %vm973_vm0 = vmmov 0   ;;  %v974_v1 = vmov 0.0   ;;  %vm240_vm1 = vcmask 261120   ;;  %v249_v2 = vld [vmem:[#allocation5] sm:$0xff]  ;;  %v250_v3 = vld [vmem:[#allocation5 + $0x8] sm:$0xff] }
  0x58   : > { %943 = vsyncadd (%p1266_p11), [#allocation6], 4294966784  ;;  %724 = vmatprep.subr.bf16.mxu0 %v972_v0  ;;  %711 = vmatprep.mubr.msk.f32.mxu0 %vm973_vm0, %v974_v1  ;;  %v251_v4 = vld [vmem:[#allocation5 + $0x10] sm:$0xff]  ;;  %v725_v5 = vpack.c.bf16 %v250_v3, %v249_v2  ;;  %v252_v6 = vld [vmem:[#allocation5 + $0x18] sm:$0xff]  ;;  %s975_s9 = smov 32   ;;  %s976_s28 = smov 96   ;;  %v341_v23 = vlaneseq }
  0x59   : > { %714 = vmatprep.subr.mxu1 %v974_v1  ;;  %716 = vmatprep.mubr.msk.f32.mxu1 %vm973_vm0, %v974_v1  ;;  %v239_v7 = vld [vmem:[%s205_s13] sm:$0xff]  ;;  %v728_v9 = vpack.c.bf16 %v252_v6, %v251_v4  ;;  %s977_s29 = smov 64   ;;  %v978_v21 = vmov 1983009808   ;;  %v979_v26 = vmov 1934713408  }
  0x5a   : > { %v241_v8 = vsel %vm240_vm1, %v239_v7, 0.0  ;;  %715 = vmatpush3.xpose.msk.msra.mxu1 %vm240_vm1, %v239_v7  ;;  %726 = vmatpush3.bf16.msra.mxu0 %v725_v5  ;;  %v253_v17 = vld [vmem:[%s1250_s2] sm:$0x1]  ;;  %v339_v22 = vunpack.c.l.s4 %v978_v21  ;;  %v342_v25 = vshrl.u32 %v341_v23, 7  ;;  %v355_v27 = vunpack.c.l.s4 %v979_v26  ;;  %s682_s10 = sshll.u32 %s1143_s25, 2  ;;  %s690_s20 = sshll.u32 %s1028_s19, 6 }
  0x5b   : > { %v242_v10 = vrot.slane %v241_v8, 4  ;;  %719 = vmatprep.subr.mxu1 %v974_v1  ;;  %727 = vmatprep.subr.bf16.mxu0 %v972_v0  ;;  %vm437_vm2 = vcmask 60416   ;;  %vm452_vm3 = vcmask 64512   ;;  %s238_s14 = scalar_lea.vmem [#allocation8], %s682_s10  ;;  %s1177_s7 = scalar_lea.hbm %s1252_s4, %s690_s20 }
  0x5c   : > { %v340_v24 = vunpack.c.0.s8 %v339_v22  ;;  %v356_v32 = vunpack.c.0.s8 %v355_v27  ;;  %s561_s26 = sshll.u32 %s238_s14, 4  ;;  %s535_s8 = scalar_lea.sflag [#allocation9], %s1143_s25  ;;  %s562_s26 = int_to_ptr.vmem [resolvable:$true] %s561_s26 }
  0x5d   : > { %v243_v11 = vadd.f32 %v242_v10, %v241_v8  ;;  %s864_s11 = scalar_lea.vmem %s562_s26, 64  ;;  %s980_s12 = smov [#allocation8]  }
  0x5e   : > { %729 = vmatpush3.bf16.msra.mxu0 %v728_v9  ;;  %v343_v30 = vsub.s32 %v340_v24, %v342_v25  ;;  %v359_v36 = vsub.s32 %v356_v32, %v342_v25  ;;  %p865_p4 = scmp.ne.s32.totalorder %s562_s26, %s864_s11  ;;  %s868_s13 = sshll.u32 %s980_s12, 4  ;;  %s869_s13 = int_to_ptr.vmem [resolvable:$false] %s868_s13 }
  0x5f   : > { %v244_v12 = vrot.slane %v243_v11, 2  ;;  %s870_s21 = scalar_lea.vmem %s869_s13, 128  ;;  %p871_p10 = scmp.lt.s32.totalorder %s562_s26, %s869_s13 }
  0x60   : > { %p866_p6 = pnand %p865_p4, %p1098_p12  ;;  %p872_p13 = scmp.lt.s32.totalorder %s870_s21, %s864_s11 }
  0x61   : > { %v245_v13 = vadd.f32 %v244_v12, %v243_v11 }
  0x62   : > { %p867_p8 = pneg %p866_p6  ;;  %p873_p3 = por %p872_p13, %p871_p10 }
  0x63   : > { %v246_v14 = vrot.slane %v245_v13, 1 }
  0x64   : > { %p874_p7 = pnand %p873_p3, %p867_p8 }
  0x65   : > { %v247_v15 = vadd.f32 %v246_v14, %v245_v13 }
  0x67   : > { %v248_v16 = vmul.f32 0.125, %v247_v15 }
  0x69   : > { %712 = vmatmul.mubr.msk.f32.vlgmr.msra.gmra.mrb[0].mxu0 %vm240_vm1, %v248_v16 }
 0x13c   : > { %v323_v18 = vpop.f32.mrb[0].mxu0 }
 0x13d   : > { %v324_v19 = vadd.f32 %v323_v18, %v253_v17  ;;  %v713_v20 = vpop.f32.mrb[1].mxu0 }
 0x13f   : > { %334 = vrot.lane.b32.xlu1 %v324_v19, %s975_s9  ;;  %328 = vrot.lane.b32.xlu0 %v324_v19, %s976_s28 }
 0x143   : > { %331 = vrot.lane.b32.xlu0 %v324_v19, %s977_s29 }
 0x1b1   : > { %v335_v28 = vpop.permute.xlu1 %334  ;;  %v329_v29 = vpop.permute.xlu0 %328 }
 0x1b2   : > { %v345_v31 = vcombine.low %v329_v29, %v335_v28 }
 0x1b4   : > { %v352_v35 = vrot.slane %v345_v31, %v343_v30 }
 0x1b5   : > { %v332_v33 = vpop.permute.xlu0 %331 }
 0x1b6   : > { %v337_v34 = vcombine.low %v324_v19, %v332_v33 }
 0x1b8   : > { %v344_v37 = vrot.slane %v337_v34, %v343_v30 }
 0x1ba   : > { %v353_v38 = vcombine.low %v344_v37, %v352_v35 }
 0x1bc   : > { %v360_v39 = vrot.slane %v353_v38, %v359_v36 }
 0x1be   : > { %717 = vmatmul.mubr.msk.f32.vlgmr.msra.gmra.mrb[0].mxu1 %vm240_vm1, %v360_v39 }
 0x1bf   : > { %720 = vmatpush3.msra.mxu1 %v239_v7  ;;  %721 = vmatprep.mubr.msk.f32.mxu1 %vm973_vm0, %v974_v1 }
 0x291   : > { %v433_v40 = vpop.f32.mrb[0].mxu1 }
 0x292   : > { %v718_v41 = vpop.f32.mrb[1].mxu1  ;;  %v438_v42 = vsel %vm437_vm2, %v433_v40, -inf }
 0x293   : > { %439 = vmax.xlane.f32.xlu1 %v438_v42 }
 0x320   : > { %v440_v43 = vpop.xlane.xlu1 %439 }
 0x321   : > { %v441_v44 = vsub.f32 %v433_v40, %v440_v43 }
 0x323   : > { %v442_v45 = vmul.f32 1.442695, %v441_v44 }
 0x325   : > { %802 = vpow2.f32 %v442_v45 }
 0x32f   : > { %v803_v46 = vpop.eup %802 }
 0x330   : > { %v444_v47 = vsel %vm437_vm2, %v803_v46, 0.0 }
 0x331   : > { %445 = vadd.xlane.f32.xlu0 %v444_v47 }
 0x3be   : > { %v446_v48 = vpop.xlane.xlu0 %445 }
 0x3bf   : > { %804 = vrcp.f32 %v446_v48 }
 0x3c9   : > { %v805_v49 = vpop.eup %804 }
 0x3ca   : > { %v448_v50 = vmul.f32 %v805_v49, %v446_v48 }
 0x3cc   : > { %v449_v51 = vsub.f32 2.0, %v448_v50 }
 0x3ce   : > { %v450_v52 = vmul.f32 %v805_v49, %v449_v51 }
 0x3d0   : > { %v451_v53 = vmul.f32 %v803_v46, %v450_v52 }
 0x3d2   : > { %722 = vmatmul.mubr.msk.f32.vlgmr.msra.gmra.mrb[2].mxu1 %vm452_vm3, %v451_v53  ;;  %528 = vst.msk [vmem:[%s238_s14] sm:$0xf] %vm437_vm2, %v451_v53 }
 0x3d3   : > { %877 = shalt.err (!%p874_p7)
}
 0x3d4   : > { %s878_s23 = scalar_lea.hbm %s1177_s7, 64  ;;  %s882_s29 = scalar_lea.hbm %s1252_s4, 128 }
 0x3d5   : > { %p879_p9 = scmp.ne.s32.totalorder %s1177_s7, %s878_s23  ;;  %p883_p0 = scmp.lt.u32.totalorder %s1177_s7, %s1252_s4 }
 0x3d6   : > { %p884_p1 = scmp.lt.u32.totalorder %s882_s29, %s878_s23  ;;  %p886_p4 = scmp.lt.u32.totalorder %s878_s23, %s1177_s7 }
 0x3d7   : > { %p880_p2 = pnand %p879_p9, %p1098_p12 }
 0x3d8   : > { %p885_p11 = por %p884_p1, %p883_p0 }
 0x3d9   : > { %p881_p5 = pneg %p880_p2 }
 0x3da   : > { %p887_p6 = por %p886_p4, %p885_p11 }
 0x3dc   : > { %p888_p8 = pnand %p887_p6, %p881_p5 }
 0x3de   : > { %891 = shalt.err (!%p888_p8)
}
 0x3df   : > { %737 = dma.vmem_to_hbm [thread:$0]  (%p1098_p12), %s562_s26, 64, %s1177_s7, %s535_s8   ;;  %vm526_vm4 = vcmask 257024  }
 0x3e0   : > { %s231_s5 = scalar_lea.vmem [#allocation7], %s682_s10  ;;  %s1204_s21 = scalar_lea.hbm %s1251_s3, %s690_s20 }
 0x3e1   : > { %s548_s11 = sshll.u32 %s231_s5, 4  ;;  %s530_s23 = scalar_lea.sflag [#allocation4], %s1143_s25  ;;  %s1206_s11 = int_to_ptr.vmem [resolvable:$true] %s548_s11 }
 0x3e2   : > { %s892_s7 = scalar_lea.vmem %s1206_s11, 64  ;;  %s981_s19 = smov [#allocation7]  }
 0x3e3   : > { %p893_p10 = scmp.ne.s32.totalorder %s1206_s11, %s892_s7  ;;  %s896_s10 = sshll.u32 %s981_s19, 4  ;;  %s897_s10 = int_to_ptr.vmem [resolvable:$false] %s896_s10 }
 0x3e4   : > { %s898_s26 = scalar_lea.vmem %s897_s10, 128  ;;  %p899_p7 = scmp.lt.s32.totalorder %s1206_s11, %s897_s10 }
 0x3e5   : > { %p894_p13 = pnand %p893_p10, %p1098_p12  ;;  %p900_p9 = scmp.lt.s32.totalorder %s898_s26, %s892_s7 }
 0x3e7   : > { %p895_p3 = pneg %p894_p13  ;;  %p901_p2 = por %p900_p9, %p899_p7 }
 0x3e9   : > { %p902_p5 = pnand %p901_p2, %p895_p3 }
 0x4a5   : > { %v522_v54 = vpop.f32.mrb[2].mxu1 }
 0x4a6   : > { %527 = vst.msk [vmem:[%s231_s5] sm:$0xf] %vm526_vm4, %v522_v54  ;;  %v723_v55 = vpop.f32.mrb[3].mxu1 }
 0x4a7   : > { %905 = shalt.err (!%p902_p5)
}
 0x4a8   : > { %s906_s25 = scalar_lea.hbm %s1204_s21, 64  ;;  %s910_s9 = scalar_lea.hbm %s1251_s3, 128 }
 0x4a9   : > { %p907_p0 = scmp.ne.s32.totalorder %s1204_s21, %s906_s25  ;;  %p911_p4 = scmp.lt.u32.totalorder %s1204_s21, %s1251_s3 }
 0x4aa   : > { %p912_p6 = scmp.lt.u32.totalorder %s910_s9, %s906_s25  ;;  %p914_p10 = scmp.lt.u32.totalorder %s906_s25, %s1204_s21 }
 0x4ab   : > { %p908_p1 = pnand %p907_p0, %p1098_p12 }
 0x4ac   : > { %p913_p8 = por %p912_p6, %p911_p4 }
 0x4ad   : > { %p909_p11 = pneg %p908_p1 }
 0x4ae   : > { %p915_p13 = por %p914_p10, %p913_p8 }
 0x4b0   : > { %p916_p3 = pnand %p915_p13, %p909_p11 }
 0x4b2   : > { %919 = shalt.err (!%p916_p3)
}
 0x4b3   : > { %736 = dma.vmem_to_hbm [thread:$0]  (%p1098_p12), %s1206_s11, 64, %s1204_s21, %s530_s23  }
 0x4b4 PF: > { %s573_s14 = sand.u32 1, %s954_s15   ;;  %p1267_p7 = scmp.ne.s32.totalorder %s1257_s22, 0 }
 0x4b5   : > { %p1268_p9 = scmp.ge.s32.totalorder %s966_s18, 2  ;;  %s574_s6 = scalar_lea.sflag [#allocation4], %s573_s14 }
 0x4b7   : > { %p749_p2 = pnand %p1268_p9, %p1267_p7 }
 0x4b9   : > { %945 = dma.done.wait (!%p749_p2), %s574_s6, 64  }
 0x4ba   : > { %947 = vsyncadd (!%p749_p2), %s574_s6, 4294967232  ;;  %s583_s5 = scalar_lea.sflag [#allocation9], %s573_s14 }
 0x4bb   : > { %949 = dma.done.wait (!%p749_p2), %s583_s5, 64  }
 0x4bc   : > { %951 = vsyncadd (!%p749_p2), %s583_s5, 4294967232  ;;  %p22_p12 = scmp.ge.s32.totalorder %s1063_s27, 4   ;;  %s1269_s15 = smov %s958_s16 }
 0x4bd   : > { %s1270_s16 = smov %s962_s17  ;;  %s1271_s17 = smov %s1094_s24 }
 0x4be   : > { %s1272_s18 = smov %s1063_s27  ;;  %24 = sbr.rel (!%p22_p12) target bundleno = 8 (0x8), region = 98 }
 0x4c5   :  { %588 = vsyncpa [#allocation3], 1 }
 0x4c6   :  { %590 = vsyncpa [#allocation3 + $0x1], 1 }
 0x4c7   :  { %591 = vsyncpa [#allocation6], 1 }
 0x4c8   :  { %592 = vsyncpa [#allocation4], 1 }
 0x4c9   :  { %594 = vsyncpa [#allocation4 + $0x1], 1 }
 0x4ca   :  { %595 = vsyncpa [#allocation9], 1 }
 0x4cb   :  { %597 = vsyncpa [#allocation9 + $0x1], 1 }

</bundles_post_ra>
